<compile_context>
chip_gen: v6e
topology: v6e:2x2x1
jax: 0.10.0
libtpu: 0.0.40
codegen_flags: <defaults>
</compile_context>

<pallas_src>
import functools

import jax
import jax.numpy as jnp
from jax.experimental import pallas as pl
from jax.experimental.pallas import tpu as pltpu


def _round_up(x: int, m: int) -> int:
    return ((x + m - 1) // m) * m


def _round_down(x: int, m: int) -> int:
    return (x // m) * m


def _critic_kernel(x_ref, w1_ref, b1_ref, w2_ref, b2_ref, o_ref):
    # x:  (TB, D)   obs tile (f32 or bf16), streamed per grid step
    # w1: (D, H)    resident across grid steps (f32 or bf16)
    # b1: (1, H)    resident, f32
    # w2: (1, H)    resident, f32 (PyTorch Linear(H, 1).weight layout)
    # b2: (1, 1)    SMEM scalar, f32
    # o:  (TB, 1)   f32 value column (masked store on the ragged last tile)
    x = x_ref[...]
    h = jnp.tanh(
        jnp.dot(x, w1_ref[...], preferred_element_type=jnp.float32) + b1_ref[...]
    )  # (TB, H) f32
    # Layer 2 as VPU multiply + XLU lane reduce over H (no (1,H)x(TB,H)^T
    # degenerate matmul -> no risk of an XLU transpose of the big h tile).
    v = jnp.sum(h * w2_ref[...], axis=1, keepdims=True)  # (TB, 1) f32
    o_ref[...] = (v + b2_ref[0, 0]).astype(o_ref.dtype)


def _choose_block_b(batch: int, requested: int, sublane: int) -> int:
    """Hardware-friendly batch tile: aligned, and >=2 grid steps when B>=256."""
    blk = max(sublane, _round_up(requested, sublane))
    if batch >= 256:
        # Keep at least two (128-aligned) grid steps so both v7x TensorCores
        # get work on the "parallel" batch axis. No-op on single-TC v5e/v6e.
        cap = _round_up(pl.cdiv(batch, 2), 128)
        blk = min(_round_up(blk, 128), cap)
    elif batch >= sublane:
        blk = min(blk, _round_down(batch, sublane))
    else:
        blk = batch  # full-extent block (allowed even when < sublane multiple)
    return blk


@functools.partial(jax.jit, static_argnames=("block_b", "use_bf16"))
def sc2_critic_forward(obs, w1, b1, w2, b2, *, block_b: int = 8192,
                       use_bf16: bool = False):
    """Fused SC2Critic forward. Returns value estimates of shape (B,).

    obs: (B, D) float32 (or bfloat16 for the fast path)
    w1:  (D, H) float32   (pre-transposed Linear(D, H) weight)
    b1:  (1, H) float32
    w2:  (1, H) float32   (Linear(H, 1).weight, PyTorch layout)
    b2:  (1, 1) float32
    """
    B, D = obs.shape
    H = w1.shape[1]

    # bf16 fast path: halves the HBM-bound obs stream; accumulation, bias and
    # tanh stay f32. (Best if the caller already supplies bf16 obs so the
    # wrapper cast does not re-stream obs through HBM.)
    use_bf16 = bool(use_bf16) or obs.dtype == jnp.bfloat16
    if use_bf16:
        obs = obs.astype(jnp.bfloat16)
        w1 = w1.astype(jnp.bfloat16)
        sublane = 16  # bf16 packs 16 rows per sublane tile
    else:
        sublane = 8

    block_b = _choose_block_b(B, block_b, sublane)

    # VMEM budget with 128-lane padding: obs double buffer + f32 temporaries
    # (pre-activation, h, products) + output double buffer. Stay under 48 MiB
    # so a tile tuned on v5e/v6e (128 MiB physical) still fits v7x (64 MiB).
    lane_pad = _round_up(max(D, H, 1), 128)
    obs_item = 2 if use_bf16 else 4
    per_row = lane_pad * (2 * obs_item + 4 * 4) + 2 * 128 * 4
    vmem_cap = 48 * 1024 * 1024
    max_rows = max(sublane, _round_down((vmem_cap - (2 << 20)) // per_row, 128))
    if block_b > max_rows:
        block_b = max_rows
    vmem_limit = int(min(vmem_cap,
                         max(32 * 1024 * 1024, block_b * per_row + (2 << 20))))

    # No wrapper pad: ragged last tile handled by Pallas partial-block
    # semantics (OOB reads -> garbage rows, OOB writes -> masked). The kernel
    # has no cross-row reductions, so garbage rows stay confined.
    grid = (pl.cdiv(B, block_b),)

    out = pl.pallas_call(
        _critic_kernel,
        out_shape=jax.ShapeDtypeStruct((B, 1), jnp.float32),
        grid=grid,
        in_specs=[
            # obs: one (block_b, D) tile per grid step -> auto double-buffered.
            pl.BlockSpec((block_b, D), lambda i: (i, 0)),
            # Weights/biases: constant block index -> fetched once, resident.
            pl.BlockSpec((D, H), lambda i: (0, 0)),
            pl.BlockSpec((1, H), lambda i: (0, 0)),
            pl.BlockSpec((1, H), lambda i: (0, 0)),
            # Scalar bias lives in SMEM (no padded VMEM tile / vector load).
            pl.BlockSpec((1, 1), lambda i: (0, 0),
                         memory_space=pltpu.MemorySpace.SMEM),
        ],
        out_specs=pl.BlockSpec((block_b, 1), lambda i: (i, 0)),
        compiler_params=pltpu.CompilerParams(
            # Batch tiles are independent -> shard across TCs on v7x megacore.
            dimension_semantics=("parallel",),
            vmem_limit_bytes=vmem_limit,
        ),
    )(obs, w1, b1, w2, b2)

    # squeeze(-1) of the (B, 1) value column, matching torch.squeeze(v, -1).
    return jnp.squeeze(out, axis=-1)


def init_params(key, obs_dim, hidden_units):
    """Deterministic PyTorch-nn.Linear-style init (uniform +/- 1/sqrt(fan_in))."""
    k1, k2, k3, k4 = jax.random.split(key, 4)
    lim1 = 1.0 / jnp.sqrt(jnp.float32(obs_dim))
    lim2 = 1.0 / jnp.sqrt(jnp.float32(hidden_units))
    w1 = jax.random.uniform(k1, (obs_dim, hidden_units), jnp.float32, -lim1, lim1)
    b1 = jax.random.uniform(k2, (1, hidden_units), jnp.float32, -lim1, lim1)
    w2 = jax.random.uniform(k3, (1, hidden_units), jnp.float32, -lim2, lim2)
    b2 = jax.random.uniform(k4, (1, 1), jnp.float32, -lim2, lim2)
    return w1, b1, w2, b2


def _reference(obs, w1, b1, w2, b2):
    return jnp.squeeze(jnp.tanh(obs @ w1 + b1) @ w2.T + b2, axis=-1)


if __name__ == "__main__":
    key = jax.random.PRNGKey(0)
    k_obs, k_obs2, k_obs3, k_params = jax.random.split(key, 4)

    obs_dim, hidden_units = 32, 32
    w1, b1, w2, b2 = init_params(k_params, obs_dim, hidden_units)

    # Case 1: small batch (single grid step, block clamped to the batch).
    batch = 8
    obs = jax.random.normal(k_obs, (batch, obs_dim), dtype=jnp.float32)
    v = jax.block_until_ready(sc2_critic_forward(obs, w1, b1, w2, b2))
    ref = _reference(obs, w1, b1, w2, b2)
    assert v.shape == (batch,)
    assert jnp.allclose(v, ref, atol=1e-5, rtol=1e-4)

    # Case 2: batch not a multiple of the tile -> exercises the ragged last
    # tile (no wrapper pad) with a multi-step grid and resident weights.
    batch2 = 200
    obs2 = jax.random.normal(k_obs2, (batch2, obs_dim), dtype=jnp.float32)
    v2 = jax.block_until_ready(
        sc2_critic_forward(obs2, w1, b1, w2, b2, block_b=128)
    )
    ref2 = _reference(obs2, w1, b1, w2, b2)
    assert v2.shape == (batch2,)
    assert jnp.allclose(v2, ref2, atol=1e-5, rtol=1e-4)

    # Case 3: B >= 256 path (tile capped to keep >=2 parallel grid steps) with
    # the default large block and a ragged final tile.
    batch3 = 1000
    obs3 = jax.random.normal(k_obs3, (batch3, obs_dim), dtype=jnp.float32)
    v3 = jax.block_until_ready(sc2_critic_forward(obs3, w1, b1, w2, b2))
    ref3 = _reference(obs3, w1, b1, w2, b2)
    assert v3.shape == (batch3,)
    assert jnp.allclose(v3, ref3, atol=1e-5, rtol=1e-4)

    # Case 4: bf16 obs/W1 fast path (HBM-bound stream halved); looser
    # tolerance since bf16 inputs break bit-for-bit parity with the f32 ref.
    v4 = jax.block_until_ready(
        sc2_critic_forward(obs2, w1, b1, w2, b2, use_bf16=True)
    )
    assert v4.shape == (batch2,)
    assert jnp.allclose(v4, ref2, atol=5e-2, rtol=5e-2)

    print("KERNEL_OK")
</pallas_src>

<mosaic_0001>
module attributes {stable_mosaic.version = 11 : i64} {
  func.func @_critic_kernel(%arg0: i32, %arg1: memref<8x32xf32, #tpu.memory_space<vmem>>, %arg2: memref<32x32xf32, #tpu.memory_space<vmem>>, %arg3: memref<1x32xf32, #tpu.memory_space<vmem>>, %arg4: memref<1x32xf32, #tpu.memory_space<vmem>>, %arg5: memref<1x1xf32, #tpu.memory_space<smem>>, %arg6: memref<8x1xf32, #tpu.memory_space<vmem>>) attributes {dimension_semantics = [#tpu.dimension_semantics<parallel>], iteration_bounds = array<i64: 1>, scalar_prefetch = 0 : i64, scratch_operands = 0 : i64, tpu.core_type = #tpu.core_type<tc>, window_params = [{transform_indices = @transform_0, window_bounds = array<i64: 8, 32>}, {pipeline_mode = #tpu.pipeline_mode<synchronous>, transform_indices = @transform_1, window_bounds = array<i64: 32, 32>}, {pipeline_mode = #tpu.pipeline_mode<synchronous>, transform_indices = @transform_2, window_bounds = array<i64: 1, 32>}, {pipeline_mode = #tpu.pipeline_mode<synchronous>, transform_indices = @transform_3, window_bounds = array<i64: 1, 32>}, {transform_indices = @transform_4, window_bounds = array<i64: 1, 1>}, {transform_indices = @transform_5, window_bounds = array<i64: 8, 1>}]} {
    %c0 = arith.constant 0 : index
    %c0_0 = arith.constant 0 : index
    %0 = vector.load %arg1[%c0, %c0_0] : memref<8x32xf32, #tpu.memory_space<vmem>>, vector<8x32xf32>
    %c0_1 = arith.constant 0 : index
    %c0_2 = arith.constant 0 : index
    %1 = vector.load %arg2[%c0_1, %c0_2] : memref<32x32xf32, #tpu.memory_space<vmem>>, vector<32x32xf32>
    %cst = arith.constant dense<0.000000e+00> : vector<8x32xf32>
    %2 = tpu.matmul %0, %1, %cst {dimension_numbers = #tpu.dot_dimension_numbers<[1], [0], [0], [1], [0, 0, 1, 1], [], []>} : vector<8x32xf32>, vector<32x32xf32>, vector<8x32xf32> -> vector<8x32xf32>
    %c0_3 = arith.constant 0 : index
    %c0_4 = arith.constant 0 : index
    %3 = vector.load %arg3[%c0_3, %c0_4] : memref<1x32xf32, #tpu.memory_space<vmem>>, vector<1x32xf32>
    %4 = vector.broadcast %3 : vector<1x32xf32> to vector<8x32xf32>
    %5 = arith.addf %2, %4 : vector<8x32xf32>
    %6 = math.tanh %5 : vector<8x32xf32>
    %c0_5 = arith.constant 0 : index
    %c0_6 = arith.constant 0 : index
    %7 = vector.load %arg4[%c0_5, %c0_6] : memref<1x32xf32, #tpu.memory_space<vmem>>, vector<1x32xf32>
    %8 = vector.broadcast %7 : vector<1x32xf32> to vector<8x32xf32>
    %9 = arith.mulf %6, %8 : vector<8x32xf32>
    %cst_7 = arith.constant dense<0.000000e+00> : vector<8xf32>
    %10 = vector.multi_reduction <add>, %9, %cst_7 [1] : vector<8x32xf32> to vector<8xf32>
    %11 = vector.shape_cast %10 : vector<8xf32> to vector<8x1xf32>
    %c0_8 = arith.constant 0 : index
    %c0_9 = arith.constant 0 : index
    %12 = memref.load %arg5[%c0_8, %c0_9] : memref<1x1xf32, #tpu.memory_space<smem>>
    %13 = vector.broadcast %12 : f32 to vector<8x1xf32>
    %14 = arith.addf %11, %13 : vector<8x1xf32>
    %c0_10 = arith.constant 0 : index
    %c0_11 = arith.constant 0 : index
    %15 = vector.load %arg6[%c0_10, %c0_11] : memref<8x1xf32, #tpu.memory_space<vmem>>, vector<8x1xf32>
    tpu.vector_store %arg6[%c0_10, %c0_11], %14 {strides = array<i32>} : memref<8x1xf32, #tpu.memory_space<vmem>>, vector<8x1xf32>,
    return
  }
  func.func @transform_0(%arg0: i32) -> (i32, i32) {
    %c0_i32 = arith.constant 0 : i32
    %c0_i32_0 = arith.constant 0 : i32
    return %arg0, %c0_i32 : i32, i32
  }
  func.func @transform_1(%arg0: i32) -> (i32, i32) {
    %c0_i32 = arith.constant 0 : i32
    %c0_i32_0 = arith.constant 0 : i32
    %c0_i32_1 = arith.constant 0 : i32
    return %c0_i32, %c0_i32_0 : i32, i32
  }
  func.func @transform_2(%arg0: i32) -> (i32, i32) {
    %c0_i32 = arith.constant 0 : i32
    %c0_i32_0 = arith.constant 0 : i32
    %c0_i32_1 = arith.constant 0 : i32
    return %c0_i32, %c0_i32_0 : i32, i32
  }
  func.func @transform_3(%arg0: i32) -> (i32, i32) {
    %c0_i32 = arith.constant 0 : i32
    %c0_i32_0 = arith.constant 0 : i32
    %c0_i32_1 = arith.constant 0 : i32
    return %c0_i32, %c0_i32_0 : i32, i32
  }
  func.func @transform_4(%arg0: i32) -> (i32, i32) {
    %c0_i32 = arith.constant 0 : i32
    %c0_i32_0 = arith.constant 0 : i32
    %c0_i32_1 = arith.constant 0 : i32
    return %c0_i32, %c0_i32_0 : i32, i32
  }
  func.func @transform_5(%arg0: i32) -> (i32, i32) {
    %c0_i32 = arith.constant 0 : i32
    %c0_i32_0 = arith.constant 0 : i32
    return %arg0, %c0_i32 : i32, i32
  }
}

</mosaic_0001>

<bundles_post_ra>
// kernel: sc2_critic_forward.1
= control target key start
LH: loop header
LB: loop body
LE: loop exit
PB: predicated region body
PF: predicated region fallthrough
CT: control target
= control target key end

     0   :  { %11 = vsyncpa [#allocation4], 0  ;;  %s281_s0 = inlined_call_operand.hbm [shape: f32[8,32], index: 0, kind: input, shape index: {}]   ;;  %s282_s1 = inlined_call_operand.hbm [shape: f32[32,32], index: 1, kind: input, shape index: {}]   ;;  %s283_s2 = inlined_call_operand.vmem [shape: f32[1,32], index: 2, kind: input, shape index: {}]   ;;  %s284_s3 = inlined_call_operand.vmem [shape: f32[1,32], index: 3, kind: input, shape index: {}]   ;;  %s285_s4 = inlined_call_operand.<no memory space> [shape: f32[1,1], index: 4, kind: input, shape index: {}]   ;;  %s286_s5 = inlined_call_operand.vmem [shape: f32[8,1], index: 5, kind: output, shape index: {}]  }
   0x1   :  { %12 = vsyncpa [#allocation6], 0  ;;  %s227_s18 = smov [#allocation3]   ;;  %s228_s20 = smov [#allocation5]  }
   0x2   :  { %s19_s19 = sshll.u32 %s227_s18, 4  ;;  %s28_s21 = sshll.u32 %s228_s20, 4  ;;  %s20_s19 = int_to_ptr.vmem [resolvable:$true] %s19_s19  ;;  %s29_s21 = int_to_ptr.vmem [resolvable:$true] %s28_s21 }
   0x3   :  { %s191_s22 = scalar_lea.vmem %s20_s19, 128  ;;  %p196_p1 = scmp.lt.s32.totalorder %s20_s19, %s20_s19 }
   0x4   :  { %p192_p0 = scmp.ne.s32.totalorder %s20_s19, %s191_s22  ;;  %p197_p2 = scmp.lt.s32.totalorder %s191_s22, %s191_s22 }
   0x6   :  { %p198_p3 = por %p197_p2, %p196_p1 }
   0x8   :  { %p199_p4 = pnand %p198_p3, %p192_p0 }
   0xa   :  { %202 = shalt.err (!%p199_p4)
}
   0xb   :  { %22 = dma.hbm_to_vmem [thread:$0]  %s281_s0, 128, %s20_s19, [#allocation4]  }
   0xc   :  { %s211_s25 = scalar_lea.vmem %s29_s21, 512  ;;  %p216_p6 = scmp.lt.s32.totalorder %s29_s21, %s29_s21 }
   0xd   :  { %p212_p5 = scmp.ne.s32.totalorder %s29_s21, %s211_s25  ;;  %p217_p7 = scmp.lt.s32.totalorder %s211_s25, %s211_s25 }
   0xf   :  { %p218_p8 = por %p217_p7, %p216_p6 }
  0x11   :  { %p219_p9 = pnand %p218_p8, %p212_p5 }
  0x13   :  { %222 = shalt.err (!%p219_p9)
}
  0x14   :  { %s229_s26 = smov 128   ;;  %s230_s27 = smov 8  }
  0x15   :  { %34 = dma.hbm_to_vmem [thread:$0]  %s282_s1, 512, %s29_s21, [#allocation6], %s229_s26, %s229_s26, %s230_s27  }
  0x16   :  { %223 = dma.done.wait [#allocation4], 128  }
  0x17   :  { %224 = vsyncadd [#allocation4], 4294967168 }
  0x18   :  { %225 = dma.done.wait [#allocation6], 512  }
  0x19   :  { %226 = vsyncadd [#allocation6], 4294966784  ;;  %v231_v0 = vmov 0.0   ;;  %vm232_vm0 = vmmov 0   ;;  %v51_v1 = vld [vmem:[#allocation5 + $0x18] sm:$0xff]  ;;  %v50_v2 = vld [vmem:[#allocation5 + $0x10] sm:$0xff]  ;;  %v146_v14 = vstv %s285_s4 }
  0x1a   :  { %164 = vmatprep.subr.mxu0 %v231_v0  ;;  %172 = vmatprep.mubr.msk.f32.mxu0 %vm232_vm0, %v231_v0  ;;  %v49_v3 = vld [vmem:[#allocation5 + $0x8] sm:$0xff]  ;;  %v48_v4 = vld [vmem:[#allocation5] sm:$0xff]  ;;  %v47_v5 = vld [vmem:[#allocation3] sm:$0xff]  ;;  %vm59_vm1 = vcmask 261120   ;;  %vm148_vm2 = vcmask 7168  }
  0x1b   :  { %165 = vmatpush3.msra.mxu0 %v51_v1  ;;  %v156_v6 = vld [vmem:[%s283_s2] ss:$0 sm:$0xff] }
  0x1c   :  { %166 = vmatprep.subr.mxu0 %v231_v0  ;;  %v158_v10 = vld [vmem:[%s284_s3] ss:$0 sm:$0xff] }
  0x1d   :  { %167 = vmatpush3.msra.mxu0 %v50_v2 }
  0x1e   :  { %168 = vmatprep.subr.mxu0 %v231_v0 }
  0x1f   :  { %169 = vmatpush3.msra.mxu0 %v49_v3 }
  0x20   :  { %170 = vmatprep.subr.mxu0 %v231_v0 }
  0x21   :  { %171 = vmatpush3.msra.mxu0 %v48_v4 }
  0x22   :  { %173 = vmatmul.mubr.msk.f32.vlgmr.msra.gmra.mxu0 %vm59_vm1, %v47_v5 }
  0xe2   :  { %v129_v7 = vpop.f32.mrf.mxu0 }
  0xe3   :  { %v130_v8 = vadd.f32 %v156_v6, %v129_v7 }
  0xe4   :  { %v174_v9 = vpop.f32.mrf.mxu0 }
  0xe5   :  { %181 = vtanh.f32 %v130_v8 }
  0xf2   :  { %v182_v11 = vpop.eup %181 }
  0xf3   :  { %v141_v12 = vmul.f32 %v182_v11, %v158_v10 }
  0xf5   :  { %v142_v13 = vsel %vm59_vm1, %v141_v12, 0.0 }
  0xf6   :  { %143 = vadd.xlane.f32.xlu0 %v142_v13 }
 0x17f   :  { %v144_v15 = vpop.xlane.xlu0 %143 }
 0x180   :  { %v147_v16 = vadd.f32 %v146_v14, %v144_v15 }
 0x182   :  { %149 = vst.msk [vmem:[%s286_s5] sm:$0xff] %vm148_vm2, %v147_v16 }
 0x183   :  { %154 = vsyncpa [#allocation4], 1 }
 0x184   :  { %155 = vsyncpa [#allocation6], 1 }

</bundles_post_ra>
